<compile_context>
chip_gen: v5e
topology: v5e:2x2
jax: 0.10.0
libtpu: 0.0.40
codegen_flags: <defaults>
</compile_context>

<pallas_src>
import functools

import jax
import jax.numpy as jnp
from jax import lax
from jax.experimental import pallas as pl
from jax.experimental.pallas import tpu as pltpu


# --------------------------------- kernel ------------------------------------

def _loss_kernel(flag_ref, pred_ref, targ_ref, whm_ref, dm_ref, out_ref, *,
                 smooth, num_iter, W):
    """One (b, c) volume: dice partial sums + soft-skeleton clDice partial sums.

    pred_ref / targ_ref : (1, D, H*W) f32 blocks (lane-dense folded layout)
    whm_ref             : (4, H*W) f32 masks [w>=1, w<=W-2, h>=1, h<=H-2]
    dm_ref              : (2, D, 1) f32 masks [d>=1, d<=D-2]
    out_ref             : (1, 8, 128) f32; lane 0, sublanes 0..5 hold the sums
    """
    D = pred_ref.shape[1]
    HW = pred_ref.shape[2]

    pred = pred_ref[...]                          # (1, D, HW)
    targ = targ_ref[...]

    # "if predictions.max() > 1.0: sigmoid" -- global max computed once in the
    # wrapper; lax.cond skips the full-volume sigmoid for probability inputs.
    probs = lax.cond(flag_ref[0] > 0, jax.nn.sigmoid, lambda v: v, pred)

    # ---- Dice partial sums for this (b, c) slab ----
    inter = jnp.sum(probs * targ)
    psum = jnp.sum(probs)
    tsum = jnp.sum(targ)

    # ---- hoisted boundary masks (loaded once, reused every iteration) ----
    m_wl = whm_ref[0:1, :]                        # (1, HW) valid (w-1) neighbor
    m_wr = whm_ref[1:2, :]                        # valid (w+1) neighbor
    m_ht = whm_ref[2:3, :]                        # valid (h-1) neighbor
    m_hb = whm_ref[3:4, :]                        # valid (h+1) neighbor
    m_dt = dm_ref[0:1, :, :]                      # (1, D, 1) valid (d-1) neighbor
    m_db = dm_ref[1:2, :, :]                      # valid (d+1) neighbor

    def box3(x):
        """Separable zero-padded 3x3x3 box average on the folded (2,D,HW) layout."""
        # W stencil: +/-1 lane shifts inside each h-row of the folded axis.
        s = (x + pltpu.roll(x, 1, axis=2) * m_wl
               + pltpu.roll(x, HW - 1, axis=2) * m_wr)
        # H stencil: +/-W lane shifts.
        s = (s + pltpu.roll(s, W, axis=2) * m_ht
               + pltpu.roll(s, HW - W, axis=2) * m_hb)
        # D stencil: +/-1 sublane shifts (no concatenate copies, no scratch).
        s = (s + pltpu.roll(s, 1, axis=1) * m_dt
               + pltpu.roll(s, D - 1, axis=1) * m_db)
        return s * (1.0 / 27.0)

    # ---- fused soft skeletonization of pred & target (one loop) ----
    stacked = jnp.concatenate(
        [jnp.clip(probs, 0.0, 1.0), jnp.clip(targ, 0.0, 1.0)], axis=0)  # (2,D,HW)
    done0 = jnp.zeros((2, 1, 1), jnp.float32)

    def body(_, carry):
        skel, done = carry

        def active(s, d):
            eroded = jnp.clip(box3(s) - smooth, 0.0, 1.0)
            opened = jnp.clip(box3(eroded), 0.0, 1.0)
            new = s * (1.0 - opened + smooth)
            sums = jnp.sum(jnp.sum(new, axis=2, keepdims=True),
                           axis=1, keepdims=True)            # (2, 1, 1)
            stop = (sums < smooth).astype(jnp.float32)
            new = jnp.where(d > 0.5, s, new)  # keep an already-converged slab
            return new, jnp.maximum(d, stop)

        def frozen(s, d):
            return s, d

        # Skip all heavy work once BOTH volumes hit the early-stop criterion.
        return lax.cond(jnp.sum(done) < 1.5, active, frozen, skel, done)

    skel, _ = lax.fori_loop(0, num_iter, body, (stacked, done0))

    # ---- clDice partial sums ----
    pred_skel = skel[0]
    targ_skel = skel[1]
    s_inter = jnp.sum(pred_skel * targ_skel)
    sp_sum = jnp.sum(pred_skel)
    st_sum = jnp.sum(targ_skel)

    # ---- emit the 6 scalars as one aligned, lane-dense VMEM tile ----
    sub = lax.broadcasted_iota(jnp.int32, (1, 8, 128), 1)
    lane = lax.broadcasted_iota(jnp.int32, (1, 8, 128), 2)
    tile = jnp.where(sub == 0, inter,
           jnp.where(sub == 1, psum,
           jnp.where(sub == 2, tsum,
           jnp.where(sub == 3, s_inter,
           jnp.where(sub == 4, sp_sum,
           jnp.where(sub == 5, st_sum, 0.0))))))
    out_ref[...] = jnp.where(lane == 0, tile, 0.0)


# --------------------------------- wrapper -----------------------------------

def combined_dice_cldice_loss(predictions, targets, *, dice_weight=1.0,
                              cldice_weight=1.0, smooth=1e-6, cldice_iter=40):
    """CombinedDiceclDiceLoss.forward (training mode, soft skeletons)."""
    B, C, D, H, W = predictions.shape
    N, HW = B * C, H * W

    # Lane-dense folded layout: one cheap HBM reshape instead of running the
    # whole skeletonization at W/128 lane occupancy.
    p = predictions.reshape(N, D, HW).astype(jnp.float32)
    t = targets.reshape(N, D, HW).astype(jnp.float32)

    # Global "logits?" flag (predictions.max() > 1.0) computed once so the
    # per-N grid keeps the exact global semantics of the PyTorch module.
    apply_sigmoid = (jnp.max(p) > 1.0).astype(jnp.int32).reshape(1)

    # Hoisted boundary masks for the folded 3x3x3 stencil (built once outside
    # the kernel; nothing mask-related is regenerated inside the 40-iter loop).
    lane = jnp.arange(HW, dtype=jnp.int32)
    w_id = lane % W
    h_id = lane // W
    wh_mask = jnp.stack([(w_id >= 1), (w_id <= W - 2),
                         (h_id >= 1), (h_id <= H - 2)]).astype(jnp.float32)  # (4,HW)
    d_id = jnp.arange(D, dtype=jnp.int32)
    d_mask = jnp.stack([(d_id >= 1), (d_id <= D - 2)]
                       ).astype(jnp.float32).reshape(2, D, 1)                # (2,D,1)

    kernel = functools.partial(_loss_kernel, smooth=float(smooth),
                               num_iter=int(cldice_iter), W=int(W))

    grid_spec = pltpu.PrefetchScalarGridSpec(
        num_scalar_prefetch=1,
        grid=(N,),
        in_specs=[
            pl.BlockSpec((1, D, HW), lambda n, flag: (n, 0, 0)),
            pl.BlockSpec((1, D, HW), lambda n, flag: (n, 0, 0)),
            pl.BlockSpec((4, HW), lambda n, flag: (0, 0)),
            pl.BlockSpec((2, D, 1), lambda n, flag: (0, 0, 0)),
        ],
        out_specs=pl.BlockSpec((1, 8, 128), lambda n, flag: (n, 0, 0)),
    )

    sums = pl.pallas_call(
        kernel,
        out_shape=jax.ShapeDtypeStruct((N, 8, 128), jnp.float32),
        grid_spec=grid_spec,
        compiler_params=pltpu.CompilerParams(
            dimension_semantics=("parallel",),
            vmem_limit_bytes=48 * 1024 * 1024),
    )(apply_sigmoid, p, t, wh_mask, d_mask)

    vals = sums[:, :6, 0]                         # (N, 6)
    inter, psum, tsum = vals[:, 0], vals[:, 1], vals[:, 2]
    s_inter, sp_sum, st_sum = vals[:, 3], vals[:, 4], vals[:, 5]

    # Final scalar combine (O(N) flops) outside the kernel keeps the grid axis
    # fully "parallel" (megacore-shardable on v7x).
    dice = (2.0 * inter + smooth) / (psum + tsum + smooth)
    dice_loss = 1.0 - jnp.mean(dice)
    cl = (2.0 * s_inter + smooth) / (sp_sum + st_sum + smooth)
    cldice_loss = 1.0 - jnp.mean(cl)
    total = dice_weight * dice_loss + cldice_weight * cldice_loss

    return {
        "total_loss": total,
        "dice_loss": dice_loss,
        "cldice_loss": cldice_loss,
        "dice_weight": dice_weight,
        "cldice_weight": cldice_weight,
    }


# ------------------------- pure-JAX reference (check) ------------------------

def _ref_box(x):
    w = jnp.full((1, 1, 3, 3, 3), 1.0 / 27.0, jnp.float32)
    y = lax.conv_general_dilated(x[:, None], w, (1, 1, 1),
                                 [(1, 1), (1, 1), (1, 1)],
                                 dimension_numbers=("NCDHW", "OIDHW", "NCDHW"))
    return y[:, 0]


def _ref_soft_skel(vol, num_iter, smooth):
    vol = jnp.clip(vol, 0.0, 1.0)

    def body(_, carry):
        skel, done = carry
        eroded = jnp.clip(_ref_box(skel) - smooth, 0.0, 1.0)
        opened = jnp.clip(_ref_box(eroded), 0.0, 1.0)
        new_skel = skel * (1.0 - opened + smooth)
        stop = (jnp.sum(new_skel) < smooth).astype(jnp.int32)
        skel = jnp.where(done > 0, skel, new_skel)
        return skel, jnp.maximum(done, stop)

    skel, _ = lax.fori_loop(0, num_iter, body, (vol, jnp.int32(0)))
    return skel


def _ref_loss(predictions, targets, dice_weight, cldice_weight, smooth, cldice_iter):
    B, C = predictions.shape[:2]
    p = predictions.reshape(B * C, *predictions.shape[2:]).astype(jnp.float32)
    t = targets.reshape(B * C, *targets.shape[2:]).astype(jnp.float32)
    probs = jnp.where(jnp.max(p) > 1.0, jax.nn.sigmoid(p), p)

    def per_n(x):
        return jnp.sum(x.reshape(x.shape[0], -1), axis=1)

    dice = (2 * per_n(probs * t) + smooth) / (per_n(probs) + per_n(t) + smooth)
    dice_loss = 1.0 - jnp.mean(dice)
    ps = _ref_soft_skel(probs, cldice_iter, smooth)
    ts = _ref_soft_skel(t, cldice_iter, smooth)
    cl = (2 * per_n(ps * ts) + smooth) / (per_n(ps) + per_n(ts) + smooth)
    cl_loss = 1.0 - jnp.mean(cl)
    return dice_weight * dice_loss + cldice_weight * cl_loss, dice_loss, cl_loss


# ----------------------------------- main -------------------------------------

if __name__ == "__main__":
    key = jax.random.PRNGKey(0)
    k1, k2 = jax.random.split(key)
    B, C, D, H, W = 2, 2, 8, 16, 16
    # predictions already in [0, 1] (probabilities); targets binary
    predictions = jax.random.uniform(k1, (B, C, D, H, W), jnp.float32)
    targets = (jax.random.uniform(k2, (B, C, D, H, W), jnp.float32) > 0.7).astype(jnp.float32)

    out = combined_dice_cldice_loss(predictions, targets,
                                    dice_weight=1.0, cldice_weight=1.0,
                                    smooth=1e-6, cldice_iter=40)
    total = jax.block_until_ready(out["total_loss"])
    dice = jax.block_until_ready(out["dice_loss"])
    cl = jax.block_until_ready(out["cldice_loss"])

    ref_total, ref_dice, ref_cl = _ref_loss(predictions, targets,
                                            dice_weight=1.0, cldice_weight=1.0,
                                            smooth=1e-6, cldice_iter=40)

    assert bool(jnp.isfinite(total)), "non-finite total loss"
    assert abs(float(total) - float(ref_total)) < 5e-3, (float(total), float(ref_total))
    assert abs(float(dice) - float(ref_dice)) < 5e-3, (float(dice), float(ref_dice))
    assert abs(float(cl) - float(ref_cl)) < 5e-3, (float(cl), float(ref_cl))
    print("KERNEL_OK")
</pallas_src>

<mosaic_0001>
module attributes {stable_mosaic.version = 11 : i64} {
  func.func @_loss_kernel(%arg0: i32, %arg1: memref<1xi32, #tpu.memory_space<smem>>, %arg2: memref<1x8x256xf32, #tpu.memory_space<vmem>>, %arg3: memref<1x8x256xf32, #tpu.memory_space<vmem>>, %arg4: memref<4x256xf32, #tpu.memory_space<vmem>>, %arg5: memref<2x8x1xf32, #tpu.memory_space<vmem>>, %arg6: memref<1x8x128xf32, #tpu.memory_space<vmem>>) attributes {dimension_semantics = [#tpu.dimension_semantics<parallel>], iteration_bounds = array<i64: 4>, scalar_prefetch = 1 : i64, scratch_operands = 0 : i64, tpu.core_type = #tpu.core_type<tc>, window_params = [{transform_indices = @transform_0, window_bounds = array<i64: 1, 8, 256>}, {transform_indices = @transform_1, window_bounds = array<i64: 1, 8, 256>}, {pipeline_mode = #tpu.pipeline_mode<synchronous>, transform_indices = @transform_2, window_bounds = array<i64: 4, 256>}, {pipeline_mode = #tpu.pipeline_mode<synchronous>, transform_indices = @transform_3, window_bounds = array<i64: 2, 8, 1>}, {transform_indices = @transform_4, window_bounds = array<i64: 1, 8, 128>}]} {
    %c0 = arith.constant 0 : index
    %c0_0 = arith.constant 0 : index
    %c0_1 = arith.constant 0 : index
    %0 = vector.load %arg2[%c0, %c0_0, %c0_1] : memref<1x8x256xf32, #tpu.memory_space<vmem>>, vector<1x8x256xf32>
    %c0_2 = arith.constant 0 : index
    %c0_3 = arith.constant 0 : index
    %c0_4 = arith.constant 0 : index
    %1 = vector.load %arg3[%c0_2, %c0_3, %c0_4] : memref<1x8x256xf32, #tpu.memory_space<vmem>>, vector<1x8x256xf32>
    %c0_5 = arith.constant 0 : index
    %2 = memref.load %arg1[%c0_5] : memref<1xi32, #tpu.memory_space<smem>>
    %c0_i32 = arith.constant 0 : i32
    %3 = arith.cmpi sgt, %2, %c0_i32 : i32
    %4 = arith.extui %3 : i1 to i32
    %c0_i32_6 = arith.constant 0 : i32
    %5 = arith.cmpi ne, %4, %c0_i32_6 : i32
    %6 = scf.if %5 -> (vector<1x8x256xf32>) {
      %87 = arith.negf %0 : vector<1x8x256xf32>
      %88 = math.exp %87 : vector<1x8x256xf32>
      %cst_37 = arith.constant 1.000000e+00 : f32
      %89 = vector.broadcast %cst_37 : f32 to vector<1x8x256xf32>
      %90 = arith.addf %89, %88 : vector<1x8x256xf32>
      %91 = arith.divf %89, %90 : vector<1x8x256xf32>
      scf.yield %91 : vector<1x8x256xf32>
    } else {
      scf.yield %0 : vector<1x8x256xf32>
    }
    %7 = arith.mulf %6, %1 : vector<1x8x256xf32>
    %8 = vector.shape_cast %7 : vector<1x8x256xf32> to vector<1x1x8x256xf32>
    %cst = arith.constant dense<0.000000e+00> : vector<1xf32>
    %9 = vector.multi_reduction <add>, %8, %cst [1, 2, 3] : vector<1x1x8x256xf32> to vector<1xf32>
    %10 = vector.shape_cast %9 : vector<1xf32> to vector<1x1x1x1xf32>
    %11 = vector.extract %10[0, 0, 0, 0] : f32 from vector<1x1x1x1xf32>
    %12 = vector.shape_cast %6 : vector<1x8x256xf32> to vector<1x1x8x256xf32>
    %cst_7 = arith.constant dense<0.000000e+00> : vector<1xf32>
    %13 = vector.multi_reduction <add>, %12, %cst_7 [1, 2, 3] : vector<1x1x8x256xf32> to vector<1xf32>
    %14 = vector.shape_cast %13 : vector<1xf32> to vector<1x1x1x1xf32>
    %15 = vector.extract %14[0, 0, 0, 0] : f32 from vector<1x1x1x1xf32>
    %16 = vector.shape_cast %1 : vector<1x8x256xf32> to vector<1x1x8x256xf32>
    %cst_8 = arith.constant dense<0.000000e+00> : vector<1xf32>
    %17 = vector.multi_reduction <add>, %16, %cst_8 [1, 2, 3] : vector<1x1x8x256xf32> to vector<1xf32>
    %18 = vector.shape_cast %17 : vector<1xf32> to vector<1x1x1x1xf32>
    %19 = vector.extract %18[0, 0, 0, 0] : f32 from vector<1x1x1x1xf32>
    %c0_9 = arith.constant 0 : index
    %c0_10 = arith.constant 0 : index
    %20 = vector.load %arg4[%c0_9, %c0_10] : memref<4x256xf32, #tpu.memory_space<vmem>>, vector<1x256xf32>
    %c1 = arith.constant 1 : index
    %c0_11 = arith.constant 0 : index
    %21 = vector.load %arg4[%c1, %c0_11] : memref<4x256xf32, #tpu.memory_space<vmem>>, vector<1x256xf32>
    %c2 = arith.constant 2 : index
    %c0_12 = arith.constant 0 : index
    %22 = vector.load %arg4[%c2, %c0_12] : memref<4x256xf32, #tpu.memory_space<vmem>>, vector<1x256xf32>
    %c3 = arith.constant 3 : index
    %c0_13 = arith.constant 0 : index
    %23 = vector.load %arg4[%c3, %c0_13] : memref<4x256xf32, #tpu.memory_space<vmem>>, vector<1x256xf32>
    %c0_14 = arith.constant 0 : index
    %c0_15 = arith.constant 0 : index
    %c0_16 = arith.constant 0 : index
    %24 = vector.load %arg5[%c0_14, %c0_15, %c0_16] : memref<2x8x1xf32, #tpu.memory_space<vmem>>, vector<1x8x1xf32>
    %c1_17 = arith.constant 1 : index
    %c0_18 = arith.constant 0 : index
    %c0_19 = arith.constant 0 : index
    %25 = vector.load %arg5[%c1_17, %c0_18, %c0_19] : memref<2x8x1xf32, #tpu.memory_space<vmem>>, vector<1x8x1xf32>
    %cst_20 = arith.constant 0.000000e+00 : f32
    %cst_21 = arith.constant 1.000000e+00 : f32
    %26 = vector.broadcast %cst_20 : f32 to vector<1x8x256xf32>
    %27 = arith.maximumf %26, %6 : vector<1x8x256xf32>
    %28 = vector.broadcast %cst_21 : f32 to vector<1x8x256xf32>
    %29 = arith.minimumf %28, %27 : vector<1x8x256xf32>
    %cst_22 = arith.constant 0.000000e+00 : f32
    %cst_23 = arith.constant 1.000000e+00 : f32
    %30 = vector.broadcast %cst_22 : f32 to vector<1x8x256xf32>
    %31 = arith.maximumf %30, %1 : vector<1x8x256xf32>
    %32 = vector.broadcast %cst_23 : f32 to vector<1x8x256xf32>
    %33 = arith.minimumf %32, %31 : vector<1x8x256xf32>
    %34 = tpu.concatenate %29, %33 in 0 : vector<1x8x256xf32>, vector<1x8x256xf32> -> vector<2x8x256xf32>
    %cst_24 = arith.constant 0.000000e+00 : f32
    %35 = vector.broadcast %cst_24 : f32 to vector<2x1x1xf32>
    %c0_i32_25 = arith.constant 0 : i32
    %c40_i32 = arith.constant 40 : i32
    %36 = arith.addi %c0_i32_25, %c40_i32 : i32
    %c1_i32 = arith.constant 1 : i32
    %37:2 = scf.for %arg7 = %c0_i32_25 to %36 step %c1_i32 iter_args(%arg8 = %34, %arg9 = %35) -> (vector<2x8x256xf32>, vector<2x1x1xf32>)  : i32 {
      %87 = vector.shape_cast %arg9 : vector<2x1x1xf32> to vector<1x2x1x1xf32>
      %cst_37 = arith.constant dense<0.000000e+00> : vector<1xf32>
      %88 = vector.multi_reduction <add>, %87, %cst_37 [1, 2, 3] : vector<1x2x1x1xf32> to vector<1xf32>
      %89 = vector.shape_cast %88 : vector<1xf32> to vector<1x1x1x1xf32>
      %90 = vector.extract %89[0, 0, 0, 0] : f32 from vector<1x1x1x1xf32>
      %cst_38 = arith.constant 1.500000e+00 : f32
      %91 = arith.cmpf olt, %90, %cst_38 : f32
      %92 = arith.extui %91 : i1 to i32
      %c0_i32_39 = arith.constant 0 : i32
      %93 = arith.cmpi ne, %92, %c0_i32_39 : i32
      %94:2 = scf.if %93 -> (vector<2x8x256xf32>, vector<2x1x1xf32>) {
        %c1_i32_40 = arith.constant 1 : i32
        %95 = tpu.dynamic_rotate %arg8 by %c1_i32_40 dim 2 : vector<2x8x256xf32>, i32 -> vector<2x8x256xf32>
        %96 = vector.shape_cast %20 : vector<1x256xf32> to vector<1x1x256xf32>
        %97 = vector.broadcast %96 : vector<1x1x256xf32> to vector<2x8x256xf32>
        %98 = arith.mulf %95, %97 : vector<2x8x256xf32>
        %99 = arith.addf %arg8, %98 : vector<2x8x256xf32>
        %c255_i32 = arith.constant 255 : i32
        %100 = tpu.dynamic_rotate %arg8 by %c255_i32 dim 2 : vector<2x8x256xf32>, i32 -> vector<2x8x256xf32>
        %101 = vector.shape_cast %21 : vector<1x256xf32> to vector<1x1x256xf32>
        %102 = vector.broadcast %101 : vector<1x1x256xf32> to vector<2x8x256xf32>
        %103 = arith.mulf %100, %102 : vector<2x8x256xf32>
        %104 = arith.addf %99, %103 : vector<2x8x256xf32>
        %c16_i32 = arith.constant 16 : i32
        %105 = tpu.dynamic_rotate %104 by %c16_i32 dim 2 : vector<2x8x256xf32>, i32 -> vector<2x8x256xf32>
        %106 = vector.shape_cast %22 : vector<1x256xf32> to vector<1x1x256xf32>
        %107 = vector.broadcast %106 : vector<1x1x256xf32> to vector<2x8x256xf32>
        %108 = arith.mulf %105, %107 : vector<2x8x256xf32>
        %109 = arith.addf %104, %108 : vector<2x8x256xf32>
        %c240_i32 = arith.constant 240 : i32
        %110 = tpu.dynamic_rotate %104 by %c240_i32 dim 2 : vector<2x8x256xf32>, i32 -> vector<2x8x256xf32>
        %111 = vector.shape_cast %23 : vector<1x256xf32> to vector<1x1x256xf32>
        %112 = vector.broadcast %111 : vector<1x1x256xf32> to vector<2x8x256xf32>
        %113 = arith.mulf %110, %112 : vector<2x8x256xf32>
        %114 = arith.addf %109, %113 : vector<2x8x256xf32>
        %c1_i32_41 = arith.constant 1 : i32
        %115 = tpu.dynamic_rotate %114 by %c1_i32_41 dim 1 : vector<2x8x256xf32>, i32 -> vector<2x8x256xf32>
        %116 = vector.broadcast %24 : vector<1x8x1xf32> to vector<2x8x256xf32>
        %117 = arith.mulf %115, %116 : vector<2x8x256xf32>
        %118 = arith.addf %114, %117 : vector<2x8x256xf32>
        %c7_i32 = arith.constant 7 : i32
        %119 = tpu.dynamic_rotate %114 by %c7_i32 dim 1 : vector<2x8x256xf32>, i32 -> vector<2x8x256xf32>
        %120 = vector.broadcast %25 : vector<1x8x1xf32> to vector<2x8x256xf32>
        %121 = arith.mulf %119, %120 : vector<2x8x256xf32>
        %122 = arith.addf %118, %121 : vector<2x8x256xf32>
        %cst_42 = arith.constant 0.0370370373 : f32
        %123 = vector.broadcast %cst_42 : f32 to vector<2x8x256xf32>
        %124 = arith.mulf %122, %123 : vector<2x8x256xf32>
        %cst_43 = arith.constant 9.99999997E-7 : f32
        %125 = vector.broadcast %cst_43 : f32 to vector<2x8x256xf32>
        %126 = arith.subf %124, %125 : vector<2x8x256xf32>
        %cst_44 = arith.constant 0.000000e+00 : f32
        %cst_45 = arith.constant 1.000000e+00 : f32
        %127 = vector.broadcast %cst_44 : f32 to vector<2x8x256xf32>
        %128 = arith.maximumf %127, %126 : vector<2x8x256xf32>
        %129 = vector.broadcast %cst_45 : f32 to vector<2x8x256xf32>
        %130 = arith.minimumf %129, %128 : vector<2x8x256xf32>
        %c1_i32_46 = arith.constant 1 : i32
        %131 = tpu.dynamic_rotate %130 by %c1_i32_46 dim 2 : vector<2x8x256xf32>, i32 -> vector<2x8x256xf32>
        %132 = vector.shape_cast %20 : vector<1x256xf32> to vector<1x1x256xf32>
        %133 = vector.broadcast %132 : vector<1x1x256xf32> to vector<2x8x256xf32>
        %134 = arith.mulf %131, %133 : vector<2x8x256xf32>
        %135 = arith.addf %130, %134 : vector<2x8x256xf32>
        %c255_i32_47 = arith.constant 255 : i32
        %136 = tpu.dynamic_rotate %130 by %c255_i32_47 dim 2 : vector<2x8x256xf32>, i32 -> vector<2x8x256xf32>
        %137 = vector.shape_cast %21 : vector<1x256xf32> to vector<1x1x256xf32>
        %138 = vector.broadcast %137 : vector<1x1x256xf32> to vector<2x8x256xf32>
        %139 = arith.mulf %136, %138 : vector<2x8x256xf32>
        %140 = arith.addf %135, %139 : vector<2x8x256xf32>
        %c16_i32_48 = arith.constant 16 : i32
        %141 = tpu.dynamic_rotate %140 by %c16_i32_48 dim 2 : vector<2x8x256xf32>, i32 -> vector<2x8x256xf32>
        %142 = vector.shape_cast %22 : vector<1x256xf32> to vector<1x1x256xf32>
        %143 = vector.broadcast %142 : vector<1x1x256xf32> to vector<2x8x256xf32>
        %144 = arith.mulf %141, %143 : vector<2x8x256xf32>
        %145 = arith.addf %140, %144 : vector<2x8x256xf32>
        %c240_i32_49 = arith.constant 240 : i32
        %146 = tpu.dynamic_rotate %140 by %c240_i32_49 dim 2 : vector<2x8x256xf32>, i32 -> vector<2x8x256xf32>
        %147 = vector.shape_cast %23 : vector<1x256xf32> to vector<1x1x256xf32>
        %148 = vector.broadcast %147 : vector<1x1x256xf32> to vector<2x8x256xf32>
        %149 = arith.mulf %146, %148 : vector<2x8x256xf32>
        %150 = arith.addf %145, %149 : vector<2x8x256xf32>
        %c1_i32_50 = arith.constant 1 : i32
        %151 = tpu.dynamic_rotate %150 by %c1_i32_50 dim 1 : vector<2x8x256xf32>, i32 -> vector<2x8x256xf32>
        %152 = vector.broadcast %24 : vector<1x8x1xf32> to vector<2x8x256xf32>
        %153 = arith.mulf %151, %152 : vector<2x8x256xf32>
        %154 = arith.addf %150, %153 : vector<2x8x256xf32>
        %c7_i32_51 = arith.constant 7 : i32
        %155 = tpu.dynamic_rotate %150 by %c7_i32_51 dim 1 : vector<2x8x256xf32>, i32 -> vector<2x8x256xf32>
        %156 = vector.broadcast %25 : vector<1x8x1xf32> to vector<2x8x256xf32>
        %157 = arith.mulf %155, %156 : vector<2x8x256xf32>
        %158 = arith.addf %154, %157 : vector<2x8x256xf32>
        %cst_52 = arith.constant 0.0370370373 : f32
        %159 = vector.broadcast %cst_52 : f32 to vector<2x8x256xf32>
        %160 = arith.mulf %158, %159 : vector<2x8x256xf32>
        %cst_53 = arith.constant 0.000000e+00 : f32
        %cst_54 = arith.constant 1.000000e+00 : f32
        %161 = vector.broadcast %cst_53 : f32 to vector<2x8x256xf32>
        %162 = arith.maximumf %161, %160 : vector<2x8x256xf32>
        %163 = vector.broadcast %cst_54 : f32 to vector<2x8x256xf32>
        %164 = arith.minimumf %163, %162 : vector<2x8x256xf32>
        %cst_55 = arith.constant 1.000000e+00 : f32
        %165 = vector.broadcast %cst_55 : f32 to vector<2x8x256xf32>
        %166 = arith.subf %165, %164 : vector<2x8x256xf32>
        %cst_56 = arith.constant 9.99999997E-7 : f32
        %167 = vector.broadcast %cst_56 : f32 to vector<2x8x256xf32>
        %168 = arith.addf %166, %167 : vector<2x8x256xf32>
        %169 = arith.mulf %arg8, %168 : vector<2x8x256xf32>
        %cst_57 = arith.constant dense<0.000000e+00> : vector<2x8xf32>
        %170 = vector.multi_reduction <add>, %169, %cst_57 [2] : vector<2x8x256xf32> to vector<2x8xf32>
        %171 = vector.shape_cast %170 : vector<2x8xf32> to vector<2x8x1xf32>
        %cst_58 = arith.constant dense<0.000000e+00> : vector<2x1xf32>
        %172 = vector.multi_reduction <add>, %171, %cst_58 [1] : vector<2x8x1xf32> to vector<2x1xf32>
        %173 = vector.shape_cast %172 : vector<2x1xf32> to vector<2x1x1xf32>
        %cst_59 = arith.constant 9.99999997E-7 : f32
        %174 = vector.broadcast %cst_59 : f32 to vector<2x1x1xf32>
        %175 = arith.cmpf olt, %173, %174 : vector<2x1x1xf32>
        %176 = arith.extui %175 : vector<2x1x1xi1> to vector<2x1x1xi32>
        %177 = arith.sitofp %176 : vector<2x1x1xi32> to vector<2x1x1xf32>
        %cst_60 = arith.constant 5.000000e-01 : f32
        %178 = vector.broadcast %cst_60 : f32 to vector<2x1x1xf32>
        %179 = arith.cmpf ogt, %arg9, %178 : vector<2x1x1xf32>
        %180 = vector.shape_cast %179 : vector<2x1x1xi1> to vector<2x1x1xi1>
        %181 = vector.broadcast %180 : vector<2x1x1xi1> to vector<2x8x256xi1>
        %182 = arith.select %181, %arg8, %169 : vector<2x8x256xi1>, vector<2x8x256xf32>
        %183 = arith.maximumf %arg9, %177 : vector<2x1x1xf32>
        scf.yield %182, %183 : vector<2x8x256xf32>, vector<2x1x1xf32>
      } else {
        scf.yield %arg8, %arg9 : vector<2x8x256xf32>, vector<2x1x1xf32>
      }
      scf.yield %94#0, %94#1 : vector<2x8x256xf32>, vector<2x1x1xf32>
    }
    %38 = vector.extract_strided_slice %37#0 {offsets = [0, 0, 0], sizes = [1, 8, 256], strides = [1, 1, 1]} : vector<2x8x256xf32> to vector<1x8x256xf32>
    %39 = vector.shape_cast %38 : vector<1x8x256xf32> to vector<8x256xf32>
    %40 = vector.extract_strided_slice %37#0 {offsets = [1, 0, 0], sizes = [1, 8, 256], strides = [1, 1, 1]} : vector<2x8x256xf32> to vector<1x8x256xf32>
    %41 = vector.shape_cast %40 : vector<1x8x256xf32> to vector<8x256xf32>
    %42 = arith.mulf %39, %41 : vector<8x256xf32>
    %43 = vector.shape_cast %42 : vector<8x256xf32> to vector<1x8x256xf32>
    %cst_26 = arith.constant dense<0.000000e+00> : vector<1xf32>
    %44 = vector.multi_reduction <add>, %43, %cst_26 [1, 2] : vector<1x8x256xf32> to vector<1xf32>
    %45 = vector.shape_cast %44 : vector<1xf32> to vector<1x1x1xf32>
    %46 = vector.extract %45[0, 0, 0] : f32 from vector<1x1x1xf32>
    %47 = vector.shape_cast %39 : vector<8x256xf32> to vector<1x8x256xf32>
    %cst_27 = arith.constant dense<0.000000e+00> : vector<1xf32>
    %48 = vector.multi_reduction <add>, %47, %cst_27 [1, 2] : vector<1x8x256xf32> to vector<1xf32>
    %49 = vector.shape_cast %48 : vector<1xf32> to vector<1x1x1xf32>
    %50 = vector.extract %49[0, 0, 0] : f32 from vector<1x1x1xf32>
    %51 = vector.shape_cast %41 : vector<8x256xf32> to vector<1x8x256xf32>
    %cst_28 = arith.constant dense<0.000000e+00> : vector<1xf32>
    %52 = vector.multi_reduction <add>, %51, %cst_28 [1, 2] : vector<1x8x256xf32> to vector<1xf32>
    %53 = vector.shape_cast %52 : vector<1xf32> to vector<1x1x1xf32>
    %54 = vector.extract %53[0, 0, 0] : f32 from vector<1x1x1xf32>
    %55 = tpu.iota {dimensions = array<i32: 1>} : vector<1x8x128xi32>
    %56 = tpu.iota {dimensions = array<i32: 2>} : vector<1x8x128xi32>
    %c0_i32_29 = arith.constant 0 : i32
    %57 = vector.broadcast %c0_i32_29 : i32 to vector<1x8x128xi32>
    %58 = arith.cmpi eq, %55, %57 : vector<1x8x128xi32>
    %c1_i32_30 = arith.constant 1 : i32
    %59 = vector.broadcast %c1_i32_30 : i32 to vector<1x8x128xi32>
    %60 = arith.cmpi eq, %55, %59 : vector<1x8x128xi32>
    %c2_i32 = arith.constant 2 : i32
    %61 = vector.broadcast %c2_i32 : i32 to vector<1x8x128xi32>
    %62 = arith.cmpi eq, %55, %61 : vector<1x8x128xi32>
    %c3_i32 = arith.constant 3 : i32
    %63 = vector.broadcast %c3_i32 : i32 to vector<1x8x128xi32>
    %64 = arith.cmpi eq, %55, %63 : vector<1x8x128xi32>
    %c4_i32 = arith.constant 4 : i32
    %65 = vector.broadcast %c4_i32 : i32 to vector<1x8x128xi32>
    %66 = arith.cmpi eq, %55, %65 : vector<1x8x128xi32>
    %c5_i32 = arith.constant 5 : i32
    %67 = vector.broadcast %c5_i32 : i32 to vector<1x8x128xi32>
    %68 = arith.cmpi eq, %55, %67 : vector<1x8x128xi32>
    %cst_31 = arith.constant 0.000000e+00 : f32
    %69 = vector.broadcast %54 : f32 to vector<1x8x128xf32>
    %70 = vector.broadcast %cst_31 : f32 to vector<1x8x128xf32>
    %71 = arith.select %68, %69, %70 : vector<1x8x128xi1>, vector<1x8x128xf32>
    %72 = vector.broadcast %50 : f32 to vector<1x8x128xf32>
    %73 = arith.select %66, %72, %71 : vector<1x8x128xi1>, vector<1x8x128xf32>
    %74 = vector.broadcast %46 : f32 to vector<1x8x128xf32>
    %75 = arith.select %64, %74, %73 : vector<1x8x128xi1>, vector<1x8x128xf32>
    %76 = vector.broadcast %19 : f32 to vector<1x8x128xf32>
    %77 = arith.select %62, %76, %75 : vector<1x8x128xi1>, vector<1x8x128xf32>
    %78 = vector.broadcast %15 : f32 to vector<1x8x128xf32>
    %79 = arith.select %60, %78, %77 : vector<1x8x128xi1>, vector<1x8x128xf32>
    %80 = vector.broadcast %11 : f32 to vector<1x8x128xf32>
    %81 = arith.select %58, %80, %79 : vector<1x8x128xi1>, vector<1x8x128xf32>
    %c0_i32_32 = arith.constant 0 : i32
    %82 = vector.broadcast %c0_i32_32 : i32 to vector<1x8x128xi32>
    %83 = arith.cmpi eq, %56, %82 : vector<1x8x128xi32>
    %cst_33 = arith.constant 0.000000e+00 : f32
    %84 = vector.broadcast %cst_33 : f32 to vector<1x8x128xf32>
    %85 = arith.select %83, %81, %84 : vector<1x8x128xi1>, vector<1x8x128xf32>
    %c0_34 = arith.constant 0 : index
    %c0_35 = arith.constant 0 : index
    %c0_36 = arith.constant 0 : index
    %86 = vector.load %arg6[%c0_34, %c0_35, %c0_36] : memref<1x8x128xf32, #tpu.memory_space<vmem>>, vector<1x8x128xf32>
    tpu.vector_store %arg6[%c0_34, %c0_35, %c0_36], %85 {strides = array<i32>} : memref<1x8x128xf32, #tpu.memory_space<vmem>>, vector<1x8x128xf32>,
    return
  }
  func.func @transform_0(%arg0: i32, %arg1: memref<1xi32, #tpu.memory_space<smem>>) -> (i32, i32, i32) {
    %c0_i32 = arith.constant 0 : i32
    %c0_i32_0 = arith.constant 0 : i32
    %c0_i32_1 = arith.constant 0 : i32
    return %arg0, %c0_i32, %c0_i32_0 : i32, i32, i32
  }
  func.func @transform_1(%arg0: i32, %arg1: memref<1xi32, #tpu.memory_space<smem>>) -> (i32, i32, i32) {
    %c0_i32 = arith.constant 0 : i32
    %c0_i32_0 = arith.constant 0 : i32
    %c0_i32_1 = arith.constant 0 : i32
    return %arg0, %c0_i32, %c0_i32_0 : i32, i32, i32
  }
  func.func @transform_2(%arg0: i32, %arg1: memref<1xi32, #tpu.memory_space<smem>>) -> (i32, i32) {
    %c0_i32 = arith.constant 0 : i32
    %c0_i32_0 = arith.constant 0 : i32
    %c0_i32_1 = arith.constant 0 : i32
    return %c0_i32, %c0_i32_0 : i32, i32
  }
  func.func @transform_3(%arg0: i32, %arg1: memref<1xi32, #tpu.memory_space<smem>>) -> (i32, i32, i32) {
    %c0_i32 = arith.constant 0 : i32
    %c0_i32_0 = arith.constant 0 : i32
    %c0_i32_1 = arith.constant 0 : i32
    %c0_i32_2 = arith.constant 0 : i32
    return %c0_i32, %c0_i32_0, %c0_i32_1 : i32, i32, i32
  }
  func.func @transform_4(%arg0: i32, %arg1: memref<1xi32, #tpu.memory_space<smem>>) -> (i32, i32, i32) {
    %c0_i32 = arith.constant 0 : i32
    %c0_i32_0 = arith.constant 0 : i32
    %c0_i32_1 = arith.constant 0 : i32
    return %arg0, %c0_i32, %c0_i32_0 : i32, i32, i32
  }
}

</mosaic_0001>

<bundles_post_ra>
// kernel: tpu_custom_call.1
= control target key start
LH: loop header
LB: loop body
LE: loop exit
PB: predicated region body
PF: predicated region fallthrough
CT: control target
= control target key end

     0   :  { %s1966_s0 = inlined_call_operand.<no memory space> [shape: s32[1], index: 0, kind: input, shape index: {}]   ;;  %s1967_s1 = inlined_call_operand.hbm [shape: f32[4,8,256], index: 1, kind: input, shape index: {}]   ;;  %s1968_s2 = inlined_call_operand.hbm [shape: f32[4,8,256], index: 2, kind: input, shape index: {}]   ;;  %s1969_s3 = inlined_call_operand.vmem [shape: f32[4,256], index: 3, kind: input, shape index: {}]   ;;  %s1970_s4 = inlined_call_operand.vmem [shape: f32[2,8,1], index: 4, kind: input, shape index: {}]   ;;  %s1971_s5 = inlined_call_operand.hbm [shape: f32[4,8,128], index: 5, kind: output, shape index: {}]  }
   0x1   :  { %1972 = sst [smem:[#allocation13_spill]] %s1967_s1 }
   0x2   :  { %10 = sst [smem:[#allocation3]] %s1966_s0 }
   0x3   :  { %11 = vsyncpa [#allocation5], 0 }
   0x4   :  { %13 = vsyncpa [#allocation5 + $0x1], 0 }
   0x5   :  { %14 = vsyncpa [#allocation8], 0 }
   0x6   :  { %16 = vsyncpa [#allocation8 + $0x1], 0 }
   0x7   :  { %17 = vsyncpa [#allocation6], 0 }
   0x8   :  { %19 = vsyncpa [#allocation6 + $0x1], 0  ;;  %s1459_s20 = smov 0   ;;  %s1461_s21 = smov 0  }
   0x9   :  { %s1463_s22 = smov 0   ;;  %s1465_s23 = smov 0  }
   0xa LB: > { %s1480_s0 = sadd.s32 4294967295, %s1366_s23   ;;  %s915_s24 = sadd.s32 4294967294, %s1366_s23   ;;  %s1366_s23 = sphi %s1465_s23, %s1987_s23   ;;  %s1362_s22 = sphi %s1463_s22, %s1986_s22   ;;  %s1358_s21 = sphi %s1461_s21, %s1985_s21   ;;  %s1354_s20 = sphi %s1459_s20, %s1984_s20  }
   0xb   : > { %s1484_s25 = sadd.s32 1, %s1366_s23   ;;  %s32_s26 = sadd.s32 1, %s1362_s22 }
   0xc   : > { %s29_s27 = ssub.s32 %s1366_s23, %s1484_s25  ;;  %p39_p0 = scmp.ne.s32.totalorder %s1362_s22, %s1358_s21 }
   0xd   : > { %p30_p1 = scmp.eq.s32.totalorder %s29_s27, 0  ;;  %p40_p2 = scmp.eq.s32.totalorder %s1366_s23, 0 }
   0xe   : > { %p45_p3 = scmp.ne.s32.totalorder %s1358_s21, %s1354_s20  ;;  %p46_p4 = scmp.eq.s32.totalorder %s1480_s0, 0 }
   0xf   : > { %s1496_s28 = scalar_select %p30_p1, %s1362_s22, %s32_s26  }
  0x10   : > { %p1498_p5 = por %p40_p2, %p39_p0  ;;  %p1502_p6 = por %p46_p4, %p45_p3 }
  0x11   : > { %p137_p7 = scmp.eq.s32.totalorder %s1480_s0, 3  ;;  %p143_p8 = scmp.eq.s32.totalorder %s915_s24, 3 }
  0x12   : > { %p1021_p9 = scmp.lt.s32.totalorder %s1366_s23, 4  ;;  %s1517_s8 = sand.u32 1, %s1362_s22  }
  0x13   : > { %p1508_p10 = por %p137_p7, %p39_p0  ;;  %p1512_p11 = por %p143_p8, %p45_p3 }
  0x14   : > { %s945_s9 = sshll.u32 %s1366_s23, 4  ;;  %s918_s10 = sshll.u32 %s1517_s8, 4 }
  0x15   : > { %s1977_s1 = sld [smem:[#allocation13_spill]]  ;;  %s173_s15 = scalar_lea.vmem [#allocation4], %s918_s10 }
  0x16   : > { %s182_s16 = sshll.u32 %s173_s15, 4  ;;  %p1526_p12 = pnand %p1021_p9, %p1498_p5  ;;  %s183_s16 = int_to_ptr.vmem [resolvable:$true] %s182_s16 }
  0x17   : > { %p924_p13 = scmp.ge.s32.totalorder %s1366_s23, 1  ;;  %p207_p0 = scmp.lt.s32.totalorder %s1366_s23, 5 }
  0x18   : > { %s170_s18 = scalar_lea.sflag [#allocation5], %s1517_s8  ;;  %p1188_p2 = pneg %p1526_p12 }
  0x1b   : > { %s178_s13 = scalar_lea.hbm %s1977_s1, %s945_s9  ;;  %s1191_s29 = scalar_lea.hbm %s1977_s1, 64 }
  0x1c   : > { %s180_s14 = sshll.u32 %s178_s13, 4  ;;  %s181_s14 = int_to_ptr.hbm [resolvable:$true] %s180_s14 }
  0x1d   : > { %s1184_s19 = sshra.s32 %s181_s14, 4  ;;  %s1185_s19 = int_to_ptr.hbm [resolvable:$true] %s1184_s19 }
  0x1e   : > { %s1186_s24 = scalar_lea.hbm %s1185_s19, 16  ;;  %p1192_p5 = scmp.lt.s32.totalorder %s1185_s19, %s1977_s1 }
  0x1f   : > { %p1187_p1 = scmp.ne.s32.totalorder %s1185_s19, %s1186_s24  ;;  %p1193_p7 = scmp.lt.s32.totalorder %s1191_s29, %s1186_s24 }
  0x21   : > { %p1189_p3 = pnand %p1188_p2, %p1187_p1  ;;  %p1194_p8 = por %p1193_p7, %p1192_p5 }
  0x23   : > { %p1190_p4 = pneg %p1189_p3 }
  0x25   : > { %p1195_p9 = pnand %p1194_p8, %p1190_p4 }
  0x27   : > { %1198 = shalt.err (!%p1195_p9)
}
  0x28   : > { %1013 = dma.hbm_to_vmem [thread:$0]  (!%p1526_p12), %s181_s14, 256, %s183_s16, %s170_s18  }
  0x29   : > { %p1550_p1 = pnand %p924_p13, %p207_p0  ;;  %s198_s19 = scalar_lea.hbm %s1968_s2, %s945_s9 }
  0x2a   : > { %s200_s24 = sshll.u32 %s198_s19, 4  ;;  %s193_s27 = scalar_lea.vmem [#allocation7], %s918_s10  ;;  %s201_s24 = int_to_ptr.hbm [resolvable:$true] %s200_s24 }
  0x2b   : > { %s202_s29 = sshll.u32 %s193_s27, 4  ;;  %s190_s11 = scalar_lea.sflag [#allocation8], %s1517_s8  ;;  %s203_s29 = int_to_ptr.vmem [resolvable:$true] %s202_s29 }
  0x2c   : > { %s1214_s12 = sshra.s32 %s201_s24, 4  ;;  %s1221_s18 = scalar_lea.hbm %s1968_s2, 64  ;;  %s1215_s12 = int_to_ptr.hbm [resolvable:$true] %s1214_s12 }
  0x2d   : > { %s1216_s1 = scalar_lea.hbm %s1215_s12, 16  ;;  %p1222_p4 = scmp.lt.s32.totalorder %s1215_s12, %s1968_s2 }
  0x2e   : > { %p1217_p3 = scmp.ne.s32.totalorder %s1215_s12, %s1216_s1  ;;  %p1223_p5 = scmp.lt.s32.totalorder %s1221_s18, %s1216_s1 }
  0x30   : > { %p1219_p13 = pnand %p1217_p3, %p1188_p2  ;;  %p1224_p7 = por %p1223_p5, %p1222_p4 }
  0x32   : > { %p1220_p0 = pneg %p1219_p13 }
  0x34   : > { %p1225_p8 = pnand %p1224_p7, %p1220_p0 }
  0x36   : > { %1228 = shalt.err (!%p1225_p8)
}
  0x37   : > { %1016 = dma.hbm_to_vmem [thread:$0]  (!%p1526_p12), %s201_s24, 256, %s203_s29, %s190_s11  }
  0x38   : > { %211 = sbr.rel (%p1550_p1) target bundleno = 1397 (0x575), region = 36  ;;  %s1572_s8 = sand.u32 (!%p1550_p1), 1, %s1358_s21  }
  0x39   : > { %s925_s10 = sshll.u32 (!%p1550_p1), %s1572_s8, 4  ;;  %s214_s26 = scalar_lea.sflag (!%p1550_p1), [#allocation5], %s1572_s8 }
  0x3a   : > { %s217_s19 = scalar_lea.vmem (!%p1550_p1), [#allocation4], %s925_s10 }
  0x3d   : > { %1341 = dma.done.wait (%p1502_p6), %s214_s26, 256  }
  0x3e   : > { %1343 = vsyncadd (%p1502_p6), %s214_s26, 4294967040  ;;  %s224_s1 = scalar_lea.sflag [#allocation8], %s1572_s8  ;;  %s227_s17 = scalar_lea.vmem [#allocation7], %s925_s10 }
  0x3f   : > { %1345 = dma.done.wait (%p1502_p6), %s224_s1, 256  }
  0x40   : > { %1347 = vsyncadd (%p1502_p6), %s224_s1, 4294967040  ;;  %v1588_v0 = vld [vmem:[%s1969_s3] ss:$4 sm:$0x3]  ;;  %v1613_v5 = vld [vmem:[%s1970_s4 + $0x8] sm:$0xff]  ;;  %s262_s10 = sld [smem:[#allocation3]] }
  0x41   : > { %v1593_v1 = vld [vmem:[%s1969_s3 + $0x1] ss:$4 sm:$0x3]  ;;  %v1598_v2 = vld [vmem:[%s1969_s3 + $0x2] ss:$4 sm:$0x3] }
  0x42   : > { %v1603_v3 = vld [vmem:[%s1969_s3 + $0x3] ss:$4 sm:$0x3]  ;;  %v259_v7 = vld [vmem:[%s217_s19 + $0x8] sm:$0xff]  ;;  %s927_s1 = sshll.u32 %s1572_s8, 3  ;;  %s1642_s29 = smov 0  }
  0x43   : > { %v1608_v4 = vld [vmem:[%s1970_s4] sm:$0xff]  ;;  %v261_v9 = vld [vmem:[%s227_s17 + $0x8] sm:$0xff]  ;;  %v930_v11 = vmul.f32 -1.442695, %v259_v7  ;;  %s1626_s27 = scalar_lea.vmem [#allocation9], %s927_s1 }
  0x44   : > { %v258_v6 = vld [vmem:[%s217_s19] sm:$0xff]  ;;  %v359_v13 = vmax.f32 %v261_v9, 0.0 }
  0x45   : > { %v260_v8 = vld [vmem:[%s227_s17] sm:$0xff]  ;;  %v929_v10 = vmul.f32 -1.442695, %v258_v6 }
  0x46   : > { %v358_v12 = vmax.f32 %v260_v8, 0.0  ;;  %v1617_v15 = vmin.f32 %v359_v13, 1.0   ;;  %v334_v16 = vadd.f32 %v261_v9, %v260_v8  ;;  %p263_p6 = scmp.gt.s32.totalorder %s262_s10, 0  ;;  %p928_p12 = scmp.le.s32.totalorder %s262_s10, 0 }
  0x47   : > { %1173 = vpow2.f32 %v929_v10 }
  0x48   : > { %1175 = vpow2.f32 %v930_v11  ;;  %v1615_v14 = vmin.f32 %v358_v12, 1.0   ;;  %335 = vadd.xlane.f32.xlu1 %v334_v16  ;;  %s966_s26 = scalar_select %p263_p6, 1, 0 }
  0x49   : > { %s975_s19 = scalar_select %p928_p12, 1, 0 }
  0x4a   : > { %v967_v32 = vstv %s966_s26 }
  0x4b   : > { %v976_v35 = vstv %s975_s19  ;;  %vm968_vm8 = vcmp.ne.s32.totalorder %v967_v32, 0 }
  0x4c   : > { %vm977_vm9 = vcmp.ne.s32.totalorder %v976_v35, 0 }
  0x4d   : > { %v1174_v17 = vpop.eup %1173 }
  0x4e   : > { %v1176_v18 = vpop.eup %1175  ;;  %v273_v19 = vadd.f32 1.0, %v1174_v17 }
  0x4f   : > { %v274_v20 = vadd.f32 1.0, %v1176_v18 }
  0x50   : > { %1177 = vrcp.f32 %v273_v19  ;;  %vm280_vm0 = vweird.f32 %v273_v19  ;;  %v286_v24 = vand.u32 2147483648, %v273_v19  ;;  %v284_v27 = vand.u32 2147483647, %v273_v19 }
  0x51   : > { %1179 = vrcp.f32 %v274_v20  ;;  %v301_v28 = vand.u32 2147483648, %v274_v20  ;;  %vm295_vm2 = vweird.f32 %v274_v20  ;;  %v299_v30 = vand.u32 2147483647, %v274_v20 }
  0x52   : > { %v287_v33 = vor.u32 1.1754944e-38, %v286_v24  ;;  %vm285_vm5 = vcmp.eq.f32.partialorder %v284_v27, 8.507059e+37 }
  0x53   : > { %v302_v37 = vor.u32 1.1754944e-38, %v301_v28  ;;  %vm300_vm7 = vcmp.eq.f32.partialorder %v299_v30, 8.507059e+37 }
  0x56   : > { %v1178_v21 = vpop.eup %1177 }
  0x57   : > { %v1180_v22 = vpop.eup %1179  ;;  %v276_v23 = vmul.f32 %v1178_v21, %v273_v19  ;;  %vm281_vm1 = vweird.f32 %v1178_v21 }
  0x58   : > { %v291_v25 = vmul.f32 %v1180_v22, %v274_v20  ;;  %vm296_vm3 = vweird.f32 %v1180_v22  ;;  %vm282_vm4 = vmor %vm280_vm0, %vm281_vm1  ;;  %v1628_v20 = vmov 0.0  }
  0x59   : > { %v277_v26 = vsub.f32 1.0, %v276_v23  ;;  %vm297_vm6 = vmor %vm295_vm2, %vm296_vm3 }
  0x5a   : > { %v292_v29 = vsub.f32 1.0, %v291_v25 }
  0x5b   : > { %v278_v31 = vmul.f32 %v1178_v21, %v277_v26 }
  0x5c   : > { %v293_v34 = vmul.f32 %v1180_v22, %v292_v29 }
  0x5d   : > { %v279_v36 = vadd.f32 %v1178_v21, %v278_v31 }
  0x5e   : > { %v294_v38 = vadd.f32 %v1180_v22, %v293_v34 }
  0x5f   : > { %v283_v39 = vsel %vm282_vm4, %v1178_v21, %v279_v36  ;;  %v1630_v21 = vmov 0.0  }
  0x60   : > { %v288_v40 = vsel %vm285_vm5, %v287_v33, %v283_v39  ;;  %v298_v41 = vsel %vm297_vm6, %v1180_v22, %v294_v38 }
  0x61   : > { %v303_v42 = vsel %vm300_vm7, %v302_v37, %v298_v41  ;;  %v969_v43 = vsel %vm968_vm8, %v288_v40, 0 }
  0x62   : > { %v973_v44 = vsel %vm968_vm8, %v303_v42, 0  ;;  %v978_v45 = vsel %vm977_vm9, %v258_v6, %v969_v43 }
  0x63   : > { %v982_v46 = vsel %vm977_vm9, %v259_v7, %v973_v44  ;;  %v312_v47 = vmul.f32 %v978_v45, %v260_v8  ;;  %v354_v48 = vmax.f32 %v978_v45, 0.0 }
  0x64   : > { %v313_v49 = vmul.f32 %v982_v46, %v261_v9  ;;  %v355_v50 = vmax.f32 %v982_v46, 0.0  ;;  %v324_v54 = vadd.f32 %v982_v46, %v978_v45 }
  0x65   : > { %v356_v51 = vmin.f32 %v354_v48, 1.0  }
  0x66   : > { %v314_v52 = vadd.f32 %v313_v49, %v312_v47  ;;  %v357_v53 = vmin.f32 %v355_v50, 1.0  }
  0x68   : > { %315 = vadd.xlane.f32.xlu0 %v314_v52 }
  0x70   : > { %325 = vadd.xlane.f32.xlu0 %v324_v54 }
  0xbb   : > { %v336_v55 = vpop.xlane.xlu1 %335 }
  0xbc   : > { %v337_v57 = vrot.slane %v336_v55, 4 }
  0xbe   : > { %v338_v60 = vadd.f32 %v337_v57, %v336_v55 }
  0xc0   : > { %v339_v63 = vrot.slane %v338_v60, 2 }
  0xc2   : > { %v340_v11 = vadd.f32 %v339_v63, %v338_v60 }
  0xc4   : > { %v341_v16 = vrot.slane %v340_v11, 1 }
  0xc6   : > { %v342_v19 = vadd.f32 %v341_v16, %v340_v11 }
  0xdb   : > { %v316_v56 = vpop.xlane.xlu0 %315 }
  0xdc   : > { %v317_v58 = vrot.slane %v316_v56, 4 }
  0xde   : > { %v318_v59 = vadd.f32 %v317_v58, %v316_v56 }
  0xe0   : > { %v319_v61 = vrot.slane %v318_v59, 2 }
  0xe2   : > { %v320_v62 = vadd.f32 %v319_v61, %v318_v59 }
  0xe3   : > { %v326_v6 = vpop.xlane.xlu0 %325 }
  0xe4   : > { %v327_v7 = vrot.slane %v326_v6, 4  ;;  %v321_v8 = vrot.slane %v320_v62, 1 }
  0xe6   : > { %v328_v9 = vadd.f32 %v327_v7, %v326_v6  ;;  %v322_v10 = vadd.f32 %v321_v8, %v320_v62 }
  0xe8   : > { %v329_v12 = vrot.slane %v328_v9, 2  ;;  %947 = vpush %v322_v10 }
  0xea   : > { %v330_v13 = vadd.f32 %v329_v12, %v328_v9 }
  0xec   : > { %v331_v17 = vrot.slane %v330_v13, 1 }
  0xee   : > { %v332_v18 = vadd.f32 %v331_v17, %v330_v13 }
  0xf0   : > { %949 = vpush %v332_v18 }
  0xf1   : > { %951 = vpush %v342_v19 }
 0x119   : > { %s1620_s17 = spop %947 }
 0x121   : > { %s1622_s13 = spop %949 }
 0x122   : > { %s1624_s24 = spop %951 }
 0x123 LB: >> { %vm374_vm10 = vcmask 0   ;;  %v1670_v32 = vmov 0   ;;  %v1672_v33 = vmov 0   ;;  %v1674_v34 = vmov 0   ;;  %s1394_s29 = sphi %s1642_s29, %s367_s29   ;;  %v1390_v51 = vphi %v356_v51, %v1983_v51   ;;  %v1386_v53 = vphi %v357_v53, %v1982_v53   ;;  %v1382_v14 = vphi %v1615_v14, %v1981_v14   ;;  %v1378_v15 = vphi %v1617_v15, %v1980_v15   ;;  %v1374_v21 = vphi %v1630_v21, %v1003_v21   ;;  %v1370_v20 = vphi %v1628_v20, %v1007_v20  }
 0x124   : >> { %v375_v22 = vsel %vm374_vm10, %v1374_v21, 0.0  ;;  %v376_v23 = vsel %vm374_vm10, %v1370_v20, 0.0  ;;  %v1676_v35 = vmov 0   ;;  %v1678_v36 = vmov 0  }
 0x125   : >> { %v377_v24 = vadd.f32 %v376_v23, %v375_v22  ;;  %v1680_v37 = vmov 0  }
 0x127   : >> { %378 = vadd.xlane.f32.xlu0 %v377_v24 }
 0x19a   : >> { %v379_v25 = vpop.xlane.xlu0 %378 }
 0x19b   : >> { %v380_v26 = vrot.slane %v379_v25, 4 }
 0x19d   : >> { %v381_v27 = vadd.f32 %v380_v26, %v379_v25 }
 0x19f   : >> { %v382_v28 = vrot.slane %v381_v27, 2 }
 0x1a1   : >> { %v383_v29 = vadd.f32 %v382_v28, %v381_v27 }
 0x1a3   : >> { %v384_v30 = vrot.slane %v383_v29, 1 }
 0x1a5   : >> { %v385_v31 = vadd.f32 %v384_v30, %v383_v29 }
 0x1a7   : >> { %953 = vpush %v385_v31 }
 0x1d8   : >> { %s1667_s11 = spop %953 }
 0x1d9   : >> { %p387_p2 = scmp.lt.f32.partialorder %s1667_s11, 1.5 }
 0x1da   : >> { %s1420_s12 = smov (%p387_p2), 1   ;;  %s1421_s14 = smov (%p387_p2), 127   ;;  %v399_v38 = vlaneseq (%p387_p2)  ;;  %v1422_v41 = vmov (%p387_p2), 0   ;;  %v1704_v44 = vperm.slane (%p387_p2), %v1588_v0, 0  ;;  %v1707_v47 = vperm.slane (%p387_p2), %v1588_v0, 1 }
 0x1db   : >> { %390 = sbr.rel (!%p387_p2) target bundleno = 1188 (0x4a4), region = 63  ;;  %395 = vrot.lane.b32.xlu1 (%p387_p2), %v1386_v53, %s1420_s12  ;;  %391 = vrot.lane.b32.xlu0 (%p387_p2), %v1390_v51, %s1420_s12  ;;  %v1720_v57 = vperm.slane (%p387_p2), %v1593_v1, 0  ;;  %v1723_v58 = vperm.slane (%p387_p2), %v1593_v1, 1  ;;  %s1423_s16 = smov (%p387_p2), 16   ;;  %v1756_v29 = vperm.slane (%p387_p2), %v1598_v2, 0  ;;  %v1759_v30 = vperm.slane (%p387_p2), %v1598_v2, 1 }
 0x1dc   : >> { %419 = vrot.lane.b32.xlu2 (%p387_p2), %v1390_v51, %s1421_s14  ;;  %1181 = vset.pattern.permute.xlu1 (%p387_p2), %v1422_v41  ;;  %v1700_v42 = vand.u32 (%p387_p2), 127, %v399_v38  ;;  %s1424_s30 = smov (%p387_p2), 112   ;;  %v1769_v35 = vperm.slane (%p387_p2), %v1603_v3, 0  ;;  %v1772_v36 = vperm.slane (%p387_p2), %v1603_v3, 1  ;;  %vm699_vm15 = vcmp.gt.f32.partialorder (%p387_p2), %v1374_v21, 0.5 }
 0x1dd   : >> { %1182 = vset.pattern.permute.xlu2 (%p387_p2), %v1422_v41  ;;  %1183 = vset.pattern.permute.xlu0 (%p387_p2), %v1422_v41  ;;  %vm700_vm0 = vcmp.gt.f32.partialorder (%p387_p2), %v1370_v20, 0.5 }
 0x1de   : >> { %vm401_vm11 = vcmp.lt.s32.totalorder (%p387_p2), %v1700_v42, 1  ;;  %vm427_vm12 = vcmp.lt.s32.totalorder (%p387_p2), %v1700_v42, 127  ;;  %vm453_vm13 = vcmp.lt.s32.totalorder (%p387_p2), %v1700_v42, 16  ;;  %vm479_vm14 = vcmp.lt.s32.totalorder (%p387_p2), %v1700_v42, 112 }
 0x1e3   : >> { %397 = vrot.lane.b32.xlu1 %v1378_v15, %s1420_s12  ;;  %393 = vrot.lane.b32.xlu0 %v1382_v14, %s1420_s12 }
 0x1e4   : >> { %421 = vrot.lane.b32.xlu2 %v1382_v14, %s1421_s14 }
 0x1eb   : >> { %425 = vrot.lane.b32.xlu1 %v1378_v15, %s1421_s14  ;;  %423 = vrot.lane.b32.xlu0 %v1386_v53, %s1421_s14 }
 0x236   : >> { %v420_v43 = vpop.permute.xlu2 %419 }
 0x23e   : >> { %v422_v56 = vpop.permute.xlu2 %421 }
 0x24d   : >> { %v396_v39 = vpop.permute.xlu1 %395  ;;  %v392_v40 = vpop.permute.xlu0 %391 }
 0x24e   : >> { %v404_v48 = vsel %vm401_vm11, %v396_v39, %v392_v40  ;;  %v402_v49 = vsel %vm401_vm11, %v392_v40, %v396_v39 }
 0x24f   : >> { %v411_v52 = vmul.f32 %v1704_v44, %v404_v48  ;;  %v412_v54 = vmul.f32 %v1707_v47, %v402_v49 }
 0x251   : >> { %v415_v59 = vadd.f32 %v1390_v51, %v411_v52  ;;  %v416_v62 = vadd.f32 %v1386_v53, %v412_v54 }
 0x255   : >> { %v398_v45 = vpop.permute.xlu1 %397  ;;  %v394_v46 = vpop.permute.xlu0 %393 }
 0x256   : >> { %v405_v50 = vsel %vm401_vm11, %v398_v45, %v394_v46  ;;  %v403_v12 = vsel %vm401_vm11, %v394_v46, %v398_v45 }
 0x257   : >> { %v413_v55 = vmul.f32 %v1704_v44, %v405_v50  ;;  %v414_v19 = vmul.f32 %v1707_v47, %v403_v12 }
 0x259   : >> { %v417_v8 = vadd.f32 %v1382_v14, %v413_v55  ;;  %v418_v23 = vadd.f32 %v1378_v15, %v414_v19 }
 0x25d   : >> { %v426_v60 = vpop.permute.xlu1 %425  ;;  %v424_v61 = vpop.permute.xlu0 %423 }
 0x25e   : >> { %v429_v63 = vsel %vm427_vm12, %v422_v56, %v426_v60  ;;  %v428_v6 = vsel %vm427_vm12, %v420_v43, %v424_v61  ;;  %v430_v7 = vsel %vm427_vm12, %v424_v61, %v420_v43  ;;  %v431_v18 = vsel %vm427_vm12, %v426_v60, %v422_v56 }
 0x25f   : >> { %v439_v9 = vmul.f32 %v1720_v57, %v429_v63  ;;  %v437_v10 = vmul.f32 %v1720_v57, %v428_v6  ;;  %v438_v11 = vmul.f32 %v1723_v58, %v430_v7  ;;  %v440_v22 = vmul.f32 %v1723_v58, %v431_v18 }
 0x261   : >> { %v443_v13 = vadd.f32 %v439_v9, %v417_v8  ;;  %v442_v16 = vadd.f32 %v438_v11, %v416_v62  ;;  %v441_v17 = vadd.f32 %v437_v10, %v415_v59  ;;  %v444_v24 = vadd.f32 %v440_v22, %v418_v23 }
 0x263   : >> { %447 = vrot.lane.b32.xlu0 %v443_v13, %s1423_s16  ;;  %449 = vrot.lane.b32.xlu1 %v442_v16, %s1423_s16 }
 0x264   : >> { %445 = vrot.lane.b32.xlu2 %v441_v17, %s1423_s16 }
 0x26b   : >> { %473 = vrot.lane.b32.xlu1 %v443_v13, %s1424_s30  ;;  %471 = vrot.lane.b32.xlu0 %v441_v17, %s1424_s30 }
 0x26c   : >> { %451 = vrot.lane.b32.xlu2 %v444_v24, %s1423_s16 }
 0x273   : >> { %503 = vperm.xlu1 %1181, %v1608_v4   ;;  %477 = vrot.lane.b32.xlu0 %v444_v24, %s1424_s30 }
 0x274   : >> { %475 = vrot.lane.b32.xlu2 %v442_v16, %s1424_s30 }
 0x27c   : >> { %520 = vperm.xlu2 %1182, %v1613_v5  }
 0x2be   : >> { %v446_v25 = vpop.permute.xlu2 %445 }
 0x2c6   : >> { %v452_v26 = vpop.permute.xlu2 %451 }
 0x2ce   : >> { %v476_v37 = vpop.permute.xlu2 %475 }
 0x2d5   : >> { %v450_v27 = vpop.permute.xlu1 %449  ;;  %v448_v28 = vpop.permute.xlu0 %447 }
 0x2d6   : >> { %v454_v31 = vsel %vm453_vm13, %v446_v25, %v450_v27  ;;  %v456_v32 = vsel %vm453_vm13, %v450_v27, %v446_v25  ;;  %v455_v49 = vsel %vm453_vm13, %v448_v28, %v452_v26  ;;  %v457_v50 = vsel %vm453_vm13, %v452_v26, %v448_v28  ;;  %v1786_v63 = vpop.permute.xlu2 %520 }
 0x2d7   : >> { %v463_v33 = vmul.f32 %v1756_v29, %v456_v32  ;;  %v464_v34 = vmul.f32 %v1759_v30, %v454_v31  ;;  %v465_v55 = vmul.f32 %v1756_v29, %v457_v50  ;;  %v466_v56 = vmul.f32 %v1759_v30, %v455_v49 }
 0x2d9   : >> { %v467_v43 = vadd.f32 %v463_v33, %v441_v17  ;;  %v468_v45 = vadd.f32 %v464_v34, %v442_v16  ;;  %v469_v12 = vadd.f32 %v465_v55, %v443_v13  ;;  %v470_v16 = vadd.f32 %v466_v56, %v444_v24 }
 0x2dd   : >> { %v474_v38 = vpop.permute.xlu1 %473  ;;  %v472_v39 = vpop.permute.xlu0 %471 }
 0x2de   : >> { %v480_v40 = vsel %vm479_vm14, %v472_v39, %v476_v37  ;;  %v482_v41 = vsel %vm479_vm14, %v476_v37, %v472_v39 }
 0x2df   : >> { %v489_v46 = vmul.f32 %v1769_v35, %v480_v40  ;;  %v490_v48 = vmul.f32 %v1772_v36, %v482_v41 }
 0x2e1   : >> { %v493_v52 = vadd.f32 %v489_v46, %v467_v43  ;;  %v494_v54 = vadd.f32 %v490_v48, %v468_v45 }
 0x2e3   : >> { %v497_v59 = vrot.slane %v493_v52, 7  ;;  %v498_v60 = vrot.slane %v494_v54, 7  ;;  %v514_v61 = vrot.slane %v493_v52, 1  ;;  %v515_v62 = vrot.slane %v494_v54, 1 }
 0x2e5   : >> { %v1788_v6 = vpop.permute.xlu1 %503  ;;  %v478_v7 = vpop.permute.xlu0 %477  ;;  %v524_v22 = vmul.f32 %v1786_v63, %v515_v62  ;;  %v523_v25 = vmul.f32 %v1786_v63, %v514_v61 }
 0x2e6   : >> { %v481_v8 = vsel %vm479_vm14, %v474_v38, %v478_v7  ;;  %v483_v9 = vsel %vm479_vm14, %v478_v7, %v474_v38  ;;  %v507_v10 = vmul.f32 %v1788_v6, %v498_v60  ;;  %v506_v11 = vmul.f32 %v1788_v6, %v497_v59 }
 0x2e7   : >> { %v491_v17 = vmul.f32 %v1769_v35, %v481_v8  ;;  %v492_v18 = vmul.f32 %v1772_v36, %v483_v9 }
 0x2e8   : >> { %v511_v19 = vadd.f32 %v507_v10, %v494_v54  ;;  %v510_v23 = vadd.f32 %v506_v11, %v493_v52 }
 0x2e9   : >> { %v495_v26 = vadd.f32 %v491_v17, %v469_v12  ;;  %v496_v27 = vadd.f32 %v492_v18, %v470_v16 }
 0x2ea   : >> { %v528_v28 = vadd.f32 %v524_v22, %v511_v19  ;;  %v527_v31 = vadd.f32 %v523_v25, %v510_v23 }
 0x2eb   : >> { %v499_v32 = vrot.slane %v495_v26, 7  ;;  %v500_v33 = vrot.slane %v496_v27, 7  ;;  %v516_v34 = vrot.slane %v495_v26, 1  ;;  %v517_v37 = vrot.slane %v496_v27, 1 }
 0x2ec   : >> { %v532_v13 = vmul.f32 0.037037037, %v528_v28  ;;  %v531_v24 = vmul.f32 0.037037037, %v527_v31 }
 0x2ed   : >> { %v508_v38 = vmul.f32 %v1788_v6, %v499_v32  ;;  %v509_v39 = vmul.f32 %v1788_v6, %v500_v33  ;;  %v525_v45 = vmul.f32 %v1786_v63, %v516_v34  ;;  %v526_v48 = vmul.f32 %v1786_v63, %v517_v37 }
 0x2ee   : >> { %v936_v40 = vadd.f32 -1e-06, %v532_v13  ;;  %v935_v41 = vadd.f32 -1e-06, %v531_v24 }
 0x2ef   : >> { %v512_v43 = vadd.f32 %v508_v38, %v495_v26  ;;  %v513_v46 = vadd.f32 %v509_v39, %v496_v27 }
 0x2f0   : >> { %v540_v49 = vmax.f32 %v936_v40, 0.0  ;;  %v539_v50 = vmax.f32 %v935_v41, 0.0 }
 0x2f1   : >> { %v529_v52 = vadd.f32 %v525_v45, %v512_v43  ;;  %v530_v54 = vadd.f32 %v526_v48, %v513_v46 }
 0x2f2   : >> { %v544_v55 = vmin.f32 %v540_v49, 1.0  ;;  %v543_v56 = vmin.f32 %v539_v50, 1.0 }
 0x2f3   : >> { %v533_v59 = vmul.f32 0.037037037, %v529_v52  ;;  %v534_v60 = vmul.f32 0.037037037, %v530_v54 }
 0x2f4   : >> { %551 = vrot.lane.b32.xlu2 %v544_v55, %s1420_s12  ;;  %547 = vrot.lane.b32.xlu0 %v543_v56, %s1420_s12 }
 0x2f5   : >> { %v937_v61 = vadd.f32 -1e-06, %v533_v59  ;;  %v938_v62 = vadd.f32 -1e-06, %v534_v60 }
 0x2f7   : >> { %v541_v7 = vmax.f32 %v937_v61, 0.0  ;;  %v542_v8 = vmax.f32 %v938_v62, 0.0 }
 0x2f9   : >> { %v545_v9 = vmin.f32 %v541_v7, 1.0  ;;  %v546_v10 = vmin.f32 %v542_v8, 1.0 }
 0x2fb   : >> { %549 = vrot.lane.b32.xlu1 %v545_v9, %s1420_s12 }
 0x2fc   : >> { %553 = vrot.lane.b32.xlu0 %v546_v10, %s1420_s12  ;;  %569 = vrot.lane.b32.xlu2 %v545_v9, %s1421_s14 }
 0x303   : >> { %567 = vrot.lane.b32.xlu1 %v543_v56, %s1421_s14 }
 0x304   : >> { %571 = vrot.lane.b32.xlu0 %v544_v55, %s1421_s14 }
 0x30b   : >> { %573 = vrot.lane.b32.xlu1 %v546_v10, %s1421_s14 }
 0x34e   : >> { %v552_v17 = vpop.permute.xlu2 %551 }
 0x356   : >> { %v570_v41 = vpop.permute.xlu2 %569 }
 0x366   : >> { %v548_v11 = vpop.permute.xlu0 %547 }
 0x367   : >> { %v555_v18 = vsel %vm401_vm11, %v548_v11, %v552_v17  ;;  %v557_v19 = vsel %vm401_vm11, %v552_v17, %v548_v11 }
 0x368   : >> { %v559_v22 = vmul.f32 %v557_v19, %v1704_v44  ;;  %v560_v23 = vmul.f32 %v555_v18, %v1707_v47 }
 0x36a   : >> { %v563_v27 = vadd.f32 %v559_v22, %v543_v56  ;;  %v564_v28 = vadd.f32 %v560_v23, %v544_v55 }
 0x36d   : >> { %v550_v12 = vpop.permute.xlu1 %549 }
 0x36e   : >> { %v554_v16 = vpop.permute.xlu0 %553 }
 0x36f   : >> { %v556_v33 = vsel %vm401_vm11, %v550_v12, %v554_v16  ;;  %v558_v34 = vsel %vm401_vm11, %v554_v16, %v550_v12 }
 0x370   : >> { %v561_v39 = vmul.f32 %v558_v34, %v1704_v44  ;;  %v562_v40 = vmul.f32 %v556_v33, %v1707_v47 }
 0x372   : >> { %v565_v48 = vadd.f32 %v561_v39, %v545_v9  ;;  %v566_v49 = vadd.f32 %v562_v40, %v546_v10 }
 0x375   : >> { %v568_v25 = vpop.permute.xlu1 %567 }
 0x376   : >> { %v572_v26 = vpop.permute.xlu0 %571 }
 0x377   : >> { %v575_v31 = vsel %vm427_vm12, %v568_v25, %v572_v26  ;;  %v577_v32 = vsel %vm427_vm12, %v572_v26, %v568_v25 }
 0x378   : >> { %v579_v37 = vmul.f32 %v575_v31, %v1720_v57  ;;  %v580_v13 = vmul.f32 %v577_v32, %v1723_v58 }
 0x37a   : >> { %v584_v24 = vadd.f32 %v580_v13, %v564_v28  ;;  %v583_v38 = vadd.f32 %v579_v37, %v563_v27 }
 0x37c   : >> { %591 = vrot.lane.b32.xlu1 %v584_v24, %s1423_s16  ;;  %587 = vrot.lane.b32.xlu2 %v583_v38, %s1423_s16 }
 0x37d   : >> { %v574_v43 = vpop.permute.xlu1 %573 }
 0x37e   : >> { %v576_v45 = vsel %vm427_vm12, %v570_v41, %v574_v43  ;;  %v578_v46 = vsel %vm427_vm12, %v574_v43, %v570_v41 }
 0x37f   : >> { %v581_v50 = vmul.f32 %v576_v45, %v1720_v57  ;;  %v582_v44 = vmul.f32 %v578_v46, %v1723_v58 }
 0x381   : >> { %v585_v52 = vadd.f32 %v581_v50, %v565_v48  ;;  %v586_v47 = vadd.f32 %v582_v44, %v566_v49 }
 0x383   : >> { %589 = vrot.lane.b32.xlu0 %v585_v52, %s1423_s16 }
 0x384   : >> { %609 = vrot.lane.b32.xlu1 %v585_v52, %s1424_s30  ;;  %593 = vrot.lane.b32.xlu2 %v586_v47, %s1423_s16 }
 0x38b   : >> { %607 = vrot.lane.b32.xlu0 %v583_v38, %s1424_s30 }
 0x38c   : >> { %611 = vrot.lane.b32.xlu2 %v584_v24, %s1424_s30 }
 0x393   : >> { %613 = vrot.lane.b32.xlu0 %v586_v47, %s1424_s30 }
 0x3d6   : >> { %v588_v54 = vpop.permute.xlu2 %587 }
 0x3de   : >> { %v594_v55 = vpop.permute.xlu2 %593 }
 0x3e6   : >> { %v612_v62 = vpop.permute.xlu2 %611 }
 0x3ee   : >> { %v592_v56 = vpop.permute.xlu1 %591 }
 0x3ef   : >> { %v595_v58 = vsel %vm453_vm13, %v588_v54, %v592_v56  ;;  %v597_v59 = vsel %vm453_vm13, %v592_v56, %v588_v54 }
 0x3f0   : >> { %v599_v60 = vmul.f32 %v597_v59, %v1756_v29  ;;  %v600_v61 = vmul.f32 %v595_v58, %v1759_v30 }
 0x3f2   : >> { %v603_v12 = vadd.f32 %v599_v60, %v583_v38  ;;  %v604_v16 = vadd.f32 %v600_v61, %v584_v24 }
 0x3f5   : >> { %v590_v57 = vpop.permute.xlu0 %589 }
 0x3f6   : >> { %v596_v8 = vsel %vm453_vm13, %v590_v57, %v594_v55  ;;  %v598_v9 = vsel %vm453_vm13, %v594_v55, %v590_v57  ;;  %v610_v34 = vpop.permute.xlu1 %609 }
 0x3f7   : >> { %v601_v19 = vmul.f32 %v598_v9, %v1756_v29  ;;  %v602_v22 = vmul.f32 %v596_v8, %v1759_v30 }
 0x3f9   : >> { %v605_v32 = vadd.f32 %v601_v19, %v585_v52  ;;  %v606_v33 = vadd.f32 %v602_v22, %v586_v47 }
 0x3fd   : >> { %v608_v7 = vpop.permute.xlu0 %607 }
 0x3fe   : >> { %v615_v10 = vsel %vm479_vm14, %v608_v7, %v612_v62  ;;  %v617_v11 = vsel %vm479_vm14, %v612_v62, %v608_v7 }
 0x3ff   : >> { %v619_v17 = vmul.f32 %v615_v10, %v1769_v35  ;;  %v620_v18 = vmul.f32 %v617_v11, %v1772_v36 }
 0x401   : >> { %v623_v23 = vadd.f32 %v619_v17, %v603_v12  ;;  %v624_v25 = vadd.f32 %v620_v18, %v604_v16 }
 0x403   : >> { %v627_v26 = vrot.slane %v623_v23, 7  ;;  %v628_v27 = vrot.slane %v624_v25, 7  ;;  %v639_v28 = vrot.slane %v623_v23, 1  ;;  %v640_v31 = vrot.slane %v624_v25, 1 }
 0x405   : >> { %v614_v37 = vpop.permute.xlu0 %613  ;;  %v631_v13 = vmul.f32 %v627_v26, %v1788_v6  ;;  %v632_v24 = vmul.f32 %v628_v27, %v1788_v6  ;;  %v643_v30 = vmul.f32 %v639_v28, %v1786_v63  ;;  %v644_v39 = vmul.f32 %v640_v31, %v1786_v63 }
 0x406   : >> { %v616_v38 = vsel %vm479_vm14, %v610_v34, %v614_v37  ;;  %v618_v29 = vsel %vm479_vm14, %v614_v37, %v610_v34 }
 0x407   : >> { %v621_v40 = vmul.f32 %v616_v38, %v1769_v35  ;;  %v622_v41 = vmul.f32 %v618_v29, %v1772_v36  ;;  %v635_v43 = vadd.f32 %v631_v13, %v623_v23  ;;  %v636_v45 = vadd.f32 %v632_v24, %v624_v25 }
 0x409   : >> { %v625_v46 = vadd.f32 %v621_v40, %v605_v32  ;;  %v626_v48 = vadd.f32 %v622_v41, %v606_v33  ;;  %v647_v49 = vadd.f32 %v643_v30, %v635_v43  ;;  %v648_v50 = vadd.f32 %v644_v39, %v636_v45 }
 0x40b   : >> { %v629_v44 = vrot.slane %v625_v46, 7  ;;  %v630_v52 = vrot.slane %v626_v48, 7  ;;  %v641_v47 = vrot.slane %v625_v46, 1  ;;  %v642_v54 = vrot.slane %v626_v48, 1 }
 0x40c   : >> { %v651_v42 = vmul.f32 0.037037037, %v647_v49  ;;  %v652_v55 = vmul.f32 0.037037037, %v648_v50  ;;  %v1425_v49 = vmov 0.0  }
 0x40d   : >> { %v633_v56 = vmul.f32 %v629_v44, %v1788_v6  ;;  %v634_v57 = vmul.f32 %v630_v52, %v1788_v6  ;;  %v645_v60 = vmul.f32 %v641_v47, %v1786_v63  ;;  %v646_v61 = vmul.f32 %v642_v54, %v1786_v63 }
 0x40e   : >> { %v655_v58 = vmax.f32 %v651_v42, 0.0  ;;  %v656_v35 = vmax.f32 %v652_v55, 0.0 }
 0x40f   : >> { %v637_v59 = vadd.f32 %v633_v56, %v625_v46  ;;  %v638_v36 = vadd.f32 %v634_v57, %v626_v48 }
 0x410   : >> { %v659_v62 = vmin.f32 %v655_v58, 1.0  ;;  %v660_v7 = vmin.f32 %v656_v35, 1.0 }
 0x411   : >> { %v649_v8 = vadd.f32 %v645_v60, %v637_v59  ;;  %v650_v9 = vadd.f32 %v646_v61, %v638_v36 }
 0x412   : >> { %v663_v10 = vsub.f32 1.0, %v659_v62  ;;  %v664_v11 = vsub.f32 1.0, %v660_v7 }
 0x413   : >> { %v653_v12 = vmul.f32 0.037037037, %v649_v8  ;;  %v654_v16 = vmul.f32 0.037037037, %v650_v9 }
 0x414   : >> { %v667_v17 = vadd.f32 1e-06, %v663_v10  ;;  %v668_v18 = vadd.f32 1e-06, %v664_v11 }
 0x415   : >> { %v657_v6 = vmax.f32 %v653_v12, 0.0  ;;  %v658_v19 = vmax.f32 %v654_v16, 0.0 }
 0x416   : >> { %v671_v22 = vmul.f32 %v1390_v51, %v667_v17  ;;  %v672_v23 = vmul.f32 %v1386_v53, %v668_v18 }
 0x417   : >> { %v661_v25 = vmin.f32 %v657_v6, 1.0  ;;  %v662_v63 = vmin.f32 %v658_v19, 1.0 }
 0x418   : >> { %v675_v26 = vadd.f32 %v672_v23, %v671_v22  ;;  %v705_v37 = vsel %vm699_vm15, %v1390_v51, %v671_v22   ;;  %v706_v36 = vsel %vm699_vm15, %v1386_v53, %v672_v23  }
 0x419   : >> { %v665_v27 = vsub.f32 1.0, %v661_v25  ;;  %v666_v28 = vsub.f32 1.0, %v662_v63 }
 0x41a   : >> { %676 = vadd.xlane.f32.xlu1 %v675_v26 }
 0x41b   : >> { %v669_v31 = vadd.f32 1e-06, %v665_v27  ;;  %v670_v32 = vadd.f32 1e-06, %v666_v28 }
 0x41d   : >> { %v673_v33 = vmul.f32 %v1382_v14, %v669_v31  ;;  %v674_v34 = vmul.f32 %v1378_v15, %v670_v32 }
 0x41f   : >> { %v678_v13 = vadd.f32 %v674_v34, %v673_v33  ;;  %v707_v35 = vsel %vm700_vm0, %v1382_v14, %v673_v33   ;;  %v708_v34 = vsel %vm700_vm0, %v1378_v15, %v674_v34  }
 0x421   : >> { %679 = vadd.xlane.f32.xlu2 %v678_v13 }
 0x48d   : >> { %v677_v24 = vpop.xlane.xlu1 %676 }
 0x48e   : >> { %v681_v38 = vrot.slane %v677_v24, 4 }
 0x490   : >> { %v682_v29 = vadd.f32 %v681_v38, %v677_v24 }
 0x492   : >> { %v683_v30 = vrot.slane %v682_v29, 2 }
 0x494   : >> { %v684_v39 = vadd.f32 %v683_v30, %v682_v29  ;;  %v680_v40 = vpop.xlane.xlu2 %679 }
 0x495   : >> { %v687_v41 = vrot.slane %v680_v40, 4 }
 0x496   : >> { %v685_v43 = vrot.slane %v684_v39, 1 }
 0x497   : >> { %v688_v45 = vadd.f32 %v687_v41, %v680_v40 }
 0x498   : >> { %v686_v46 = vadd.f32 %v685_v43, %v684_v39 }
 0x499   : >> { %v689_v48 = vrot.slane %v688_v45, 2 }
 0x49a   : >> { %vm693_vm1 = vcmp.lt.f32.partialorder %v686_v46, 1e-06 }
 0x49b   : >> { %v939_v50 = vsel %vm693_vm1, 1.0, %v1425_v49  ;;  %v690_v44 = vadd.f32 %v689_v48, %v688_v45 }
 0x49c   : >> { %v709_v33 = vmax.f32 %v1374_v21, %v939_v50  }
 0x49d   : >> { %v691_v52 = vrot.slane %v690_v44, 1 }
 0x49f   : >> { %v692_v47 = vadd.f32 %v691_v52, %v690_v44 }
 0x4a1   : >> { %vm694_vm2 = vcmp.lt.f32.partialorder %v692_v47, 1e-06 }
 0x4a2   : >> { %v940_v54 = vsel %vm694_vm2, 1.0, %v1425_v49 }
 0x4a3   : >> { %v710_v32 = vmax.f32 %v1370_v20, %v940_v54  }
 0x4a4 PF: >> { %s1024_s18 = scalar_select %p387_p2, 0, 1  ;;  %v1418_v37 = vphi %v1680_v37, %v705_v37   ;;  %v1414_v36 = vphi %v1678_v36, %v706_v36   ;;  %v1410_v35 = vphi %v1676_v35, %v707_v35   ;;  %v1406_v34 = vphi %v1674_v34, %v708_v34   ;;  %v1402_v33 = vphi %v1672_v33, %v709_v33   ;;  %v1398_v32 = vphi %v1670_v32, %v710_v32  }
 0x4a5   : >> { %s367_s29 = sadd.s32 1, %s1394_s29  }
 0x4a6   : >> { %v985_v42 = vstv %s1024_s18  ;;  %p364_p9 = scmp.ge.s32.totalorder %s367_s29, 40  }
 0x4a7   : >> { %vm986_vm3 = vcmp.ne.s32.totalorder %v985_v42, 0  ;;  %s942_s9 = sshll.u32 (%p364_p9), %s1480_s0, 3  ;;  %v774_v25 = vstv (%p364_p9), %s1624_s24  ;;  %v776_v27 = vstv (%p364_p9), %s1622_s13  ;;  %v778_v31 = vstv (%p364_p9), %s1620_s17  ;;  %s796_s0 = sshll.u32 (%p364_p9), %s1626_s27, 4  ;;  %s797_s0 = int_to_ptr.vmem [resolvable:$true] %s796_s0 }
 0x4a8   : >> { %v987_v55 = vsel %vm986_vm3, %v1390_v51, %v1418_v37   ;;  %v991_v56 = vsel %vm986_vm3, %v1386_v53, %v1414_v36   ;;  %v995_v57 = vsel %vm986_vm3, %v1382_v14, %v1410_v35   ;;  %v999_v58 = vsel %vm986_vm3, %v1378_v15, %v1406_v34   ;;  %366 = sbr.rel (!%p364_p9) target bundleno = 291 (0x123), region = 121  ;;  %s794_s29 = scalar_lea.hbm (%p364_p9), %s1971_s5, %s942_s9 }
 0x4a9   : >> { %v1003_v21 = vsel %vm986_vm3, %v1374_v21, %v1402_v33   ;;  %v1007_v20 = vsel %vm986_vm3, %v1370_v20, %v1398_v32   ;;  %v1980_v15 = vmov %v999_v58  ;;  %v1981_v14 = vmov %v995_v57  ;;  %s798_s11 = sshll.u32 (%p364_p9), %s794_s29, 4  ;;  %s784_s24 = scalar_lea.sflag (%p364_p9), [#allocation6], %s1572_s8  ;;  %s799_s11 = int_to_ptr.hbm [resolvable:$true] %s798_s11 }
 0x4aa   : >> { %v1982_v53 = vmov %v991_v56  ;;  %v1983_v51 = vmov %v987_v55  ;;  %v727_v37 = vmul.f32 (%p364_p9), %v999_v58, %v991_v56  ;;  %v748_v35 = vadd.f32 (%p364_p9), %v999_v58, %v995_v57  ;;  %s1258_s12 = sshra.s32 (%p364_p9), %s799_s11, 4  ;;  %s1264_s16 = scalar_lea.hbm (%p364_p9), %s1971_s5, 32  ;;  %s1259_s12 = int_to_ptr.hbm [resolvable:$true] %s1258_s12 }
 0x4ab   : > { %v726_v51 = vmul.f32 (%p364_p9), %v995_v57, %v987_v55  ;;  %v738_v36 = vadd.f32 (%p364_p9), %v991_v56, %v987_v55  ;;  %v758_v20 = vlaneseq (%p364_p9)  ;;  %s1260_s14 = scalar_lea.hbm (%p364_p9), %s1259_s12, 8  ;;  %p1265_p0 = scmp.lt.s32.totalorder (%p364_p9), %s1259_s12, %s1971_s5 }
 0x4ac   : > { %749 = vadd.xlane.f32.xlu1 (%p364_p9), %v748_v35  ;;  %p1261_p1 = scmp.ne.s32.totalorder (%p364_p9), %s1259_s12, %s1260_s14  ;;  %p1266_p4 = scmp.lt.s32.totalorder (%p364_p9), %s1264_s16, %s1260_s14 }
 0x4ad   : > { %v728_v59 = vadd.f32 %v727_v37, %v726_v51  ;;  %v759_v21 = vshrl.u32 %v758_v20, 7  ;;  %v761_v22 = vand.u32 127, %v758_v20 }
 0x4ae   : > { %p1262_p3 = pnand %p1261_p1, %p1508_p10  ;;  %p1267_p5 = por %p1266_p4, %p1265_p0 }
 0x4af   : > { %729 = vadd.xlane.f32.xlu0 %v728_v59  ;;  %vm767_vm4 = vcmp.eq.s32.totalorder %v759_v21, 5  ;;  %vm766_vm5 = vcmp.eq.s32.totalorder %v759_v21, 4  ;;  %vm765_vm6 = vcmp.eq.s32.totalorder %v759_v21, 3  ;;  %vm764_vm7 = vcmp.eq.s32.totalorder %v759_v21, 2 }
 0x4b0   : > { %vm763_vm8 = vcmp.eq.s32.totalorder %v759_v21, 1  ;;  %vm762_vm9 = vcmp.eq.s32.totalorder %v759_v21, 0  ;;  %vm780_vm10 = vcmp.eq.s32.totalorder %v761_v22, 0  ;;  %p1263_p13 = pneg %p1262_p3 }
 0x4b2   : > { %p1268_p7 = pnand %p1267_p5, %p1263_p13 }
 0x4b7   : > { %739 = vadd.xlane.f32.xlu0 %v738_v36 }
 0x51f   : > { %v750_v60 = vpop.xlane.xlu1 %749 }
 0x520   : > { %v751_v62 = vrot.slane %v750_v60, 4 }
 0x522   : > { %v730_v61 = vpop.xlane.xlu0 %729  ;;  %v752_v9 = vadd.f32 %v751_v62, %v750_v60 }
 0x523   : > { %v731_v7 = vrot.slane %v730_v61, 4 }
 0x524   : > { %v753_v12 = vrot.slane %v752_v9, 2 }
 0x525   : > { %v732_v8 = vadd.f32 %v731_v7, %v730_v61 }
 0x526   : > { %v754_v2 = vadd.f32 %v753_v12, %v752_v9 }
 0x527   : > { %v733_v10 = vrot.slane %v732_v8, 2 }
 0x528   : > { %v755_v5 = vrot.slane %v754_v2, 1 }
 0x529   : > { %v734_v11 = vadd.f32 %v733_v10, %v732_v8 }
 0x52a   : > { %v740_v16 = vpop.xlane.xlu0 %739  ;;  %v756_v53 = vadd.f32 %v755_v5, %v754_v2 }
 0x52b   : > { %v741_v17 = vrot.slane %v740_v16, 4  ;;  %v735_v18 = vrot.slane %v734_v11, 1 }
 0x52d   : > { %v742_v0 = vadd.f32 %v741_v17, %v740_v16  ;;  %v736_v1 = vadd.f32 %v735_v18, %v734_v11 }
 0x52f   : > { %v743_v3 = vrot.slane %v742_v0, 2  ;;  %955 = vpush %v736_v1 }
 0x531   : > { %v744_v4 = vadd.f32 %v743_v3, %v742_v0 }
 0x533   : > { %v745_v14 = vrot.slane %v744_v4, 1 }
 0x535   : > { %v746_v15 = vadd.f32 %v745_v14, %v744_v4 }
 0x537   : > { %957 = vpush %v746_v15 }
 0x538   : > { %959 = vpush %v756_v53 }
 0x560   : > { %s956_s15 = spop %955 }
 0x561   : > { %v772_v63 = vstv %s956_s15 }
 0x568   : > { %s958_s10 = spop %957 }
 0x569   : > { %v770_v6 = vstv %s958_s10  ;;  %s960_s26 = spop %959 }
 0x56a   : > { %v768_v19 = vstv %s960_s26 }
 0x56b   : > { %v769_v23 = vsel %vm767_vm4, %v768_v19, 0.0 }
 0x56c   : > { %v771_v26 = vsel %vm766_vm5, %v770_v6, %v769_v23 }
 0x56d   : > { %v773_v28 = vsel %vm765_vm6, %v772_v63, %v771_v26 }
 0x56e   : > { %v775_v32 = vsel %vm764_vm7, %v774_v25, %v773_v28 }
 0x56f   : > { %v777_v33 = vsel %vm763_vm8, %v776_v27, %v775_v32 }
 0x570   : > { %v779_v34 = vsel %vm762_vm9, %v778_v31, %v777_v33 }
 0x571   : > { %v781_v13 = vsel %vm780_vm10, %v779_v34, 0.0 }
 0x572   : > { %782 = vst [vmem:[%s1626_s27] sm:$0xff] %v781_v13 }
 0x573   : > { %1271 = shalt.err (!%p1268_p7)
}
 0x574   : > { %1008 = dma.vmem_to_hbm [thread:$0]  (%p1508_p10), %s797_s0, 128, %s799_s11, %s784_s24  }
 0x575 PF: > { %p1030_p8 = scmp.ge.s32.totalorder %s1366_s23, 2  ;;  %s810_s8 = sand.u32 1, %s1354_s20  }
 0x576   : > { %s811_s27 = scalar_lea.sflag [#allocation6], %s810_s8 }
 0x577   : > { %p1018_p6 = pnand %p1030_p8, %p1512_p11 }
 0x579   : > { %p1019_p12 = pneg %p1018_p6 }
 0x57b   : > { %1349 = dma.done.wait (%p1019_p12), %s811_s27, 128  }
 0x57c   : > { %1351 = vsyncadd (%p1019_p12), %s811_s27, 4294967168  ;;  %p22_p2 = scmp.ge.s32.totalorder %s1484_s25, 6   ;;  %s1984_s20 = smov %s1358_s21 }
 0x57d   : > { %s1985_s21 = smov %s1362_s22  ;;  %s1986_s22 = smov %s1496_s28 }
 0x57e   : > { %s1987_s23 = smov %s1484_s25  ;;  %24 = sbr.rel (!%p22_p2) target bundleno = 10 (0xa), region = 132 }
 0x583   :  { %817 = vsyncpa [#allocation5], 1 }
 0x584   :  { %819 = vsyncpa [#allocation5 + $0x1], 1 }
 0x585   :  { %820 = vsyncpa [#allocation8], 1 }
 0x586   :  { %822 = vsyncpa [#allocation8 + $0x1], 1 }
 0x587   :  { %823 = vsyncpa [#allocation6], 1 }
 0x588   :  { %825 = vsyncpa [#allocation6 + $0x1], 1 }

</bundles_post_ra>
